<compile_context>
chip_gen: v6e
topology: v6e:2x2x1
jax: 0.10.0
libtpu: 0.0.40
codegen_flags: <defaults>
</compile_context>

<pallas_src>
import jax
import jax.numpy as jnp
from jax.experimental import pallas as pl
from jax.experimental.pallas import tpu as pltpu

_LANE = 128


# ---------------------------------------------------------------------------
# Pallas kernel: out = where(keep != 0, img, pm)
#   img block : (TB, TN)    -- TB images, TN flattened pixels (mult. of 128)
#   pm / keep : (1,  Npad)  -- VMEM-resident constants; sliced per lane tile
# ---------------------------------------------------------------------------
def _apply_patch_kernel(img_ref, pm_ref, keep_ref, out_ref):
    tn = img_ref.shape[1]
    start = pl.multiple_of(pl.program_id(0) * tn, _LANE)   # lane-tile axis = 0
    keep = keep_ref[:, pl.ds(start, tn)]                   # (1, TN)
    pm = pm_ref[:, pl.ds(start, tn)]                       # (1, TN)
    out_ref[...] = jnp.where(keep != 0, img_ref[...], pm)


def _default_tile_bytes():
    """Generation-aware tile budget (~roofline-saturating, VMEM-safe)."""
    try:
        kind = jax.devices()[0].device_kind.lower()
    except Exception:
        return 2 << 20
    if "v5 lite" in kind or "v5e" in kind or "v5lite" in kind:
        return 3 << 20          # keeps double-buffered footprint small on v5e
    return 4 << 20              # v6e / v7x: amortize per-step overhead further


def _choose_batch_tile(B, itemsize):
    """Dtype-aware sublane tile: 8 rows f32, 16 bf16, 32 int8/fp8."""
    rows = max(8, 32 // max(itemsize, 1))
    if B % rows == 0:
        return rows
    if B % 8 == 0:
        tb, d = 8, 8
        while d <= rows:
            if B % d == 0:
                tb = d
            d += 8
        return tb
    return B          # block dim equal to the full array dim is always legal


def _choose_tiles(B, N, itemsize, target_tile_bytes):
    """Pick (TB, TN, Npad) honoring the (8,128) constraint and ~MiB tiles."""
    tb = _choose_batch_tile(B, itemsize)
    Np = -(-N // _LANE) * _LANE                 # flat length, lane-aligned
    r_total = Np // _LANE
    budget_r = max(1, target_tile_bytes // (tb * _LANE * itemsize))
    if r_total <= budget_r:
        tn_r = r_total                          # whole flattened image per tile
    else:
        best = 1
        for d in range(1, budget_r + 1):
            if r_total % d == 0:
                best = d
        # If the best divisor is tiny relative to budget (no nice factor),
        # fall back to a round ~budget-sized TN and pad (rare path).
        tn_r = best if best * 8 >= budget_r else budget_r
    Npad = -(-r_total // tn_r) * tn_r * _LANE
    return tb, tn_r * _LANE, Npad


def apply_patch_pallas(img, pm_f32, keep_f32, *, target_tile_bytes=None):
    """img: (B, C, H, W); pm_f32 = patch_t*mask_t, keep_f32 = (mask_t==0) ? 1 : 0,
    both (C, H, W) float32 (precomputed in the wrapper, before any downcast)."""
    B, C, H, W = img.shape
    N = C * H * W
    dtype = img.dtype
    itemsize = jnp.dtype(dtype).itemsize
    if target_tile_bytes is None:
        target_tile_bytes = _default_tile_bytes()
    TB, TN, Npad = _choose_tiles(B, N, itemsize, target_tile_bytes)

    img_flat = img.reshape(B, N)                      # contiguous collapse: free
    pm_flat = pm_f32.astype(dtype).reshape(1, N)      # 0/1 and patch*mask exact
    keep_flat = keep_f32.astype(dtype).reshape(1, N)
    if Npad != N:
        # Rare path (flat length with no convenient divisor / not lane-aligned):
        # costs one extra pad + slice pass over img in HBM.
        pad = ((0, 0), (0, Npad - N))
        img_flat = jnp.pad(img_flat, pad)
        pm_flat = jnp.pad(pm_flat, pad)
        keep_flat = jnp.pad(keep_flat, pad)           # keep=0 -> out=pm=0 there

    grid_n = Npad // TN                               # lane tiles (outer, axis 0)
    grid_b = B // TB                                  # batch tiles (inner, axis 1)

    # Actual VMEM footprint: double-buffered img in + out tiles, plus the two
    # resident constants (double-buffered by the pipeline even though their
    # block index never changes), plus slack.
    tile_bytes = TB * TN * itemsize
    const_bytes = Npad * itemsize
    vmem_needed = 4 * tile_bytes + 4 * const_bytes + (2 << 20)
    vmem_limit = int(min(max(vmem_needed, 16 << 20), 32 << 20))

    out_flat = pl.pallas_call(
        _apply_patch_kernel,
        out_shape=jax.ShapeDtypeStruct((B, Npad), dtype),
        grid_spec=pltpu.PrefetchScalarGridSpec(
            num_scalar_prefetch=0,
            grid=(grid_n, grid_b),
            in_specs=[
                pl.BlockSpec((TB, TN), lambda n, b: (b, n)),     # img
                pl.BlockSpec((1, Npad), lambda n, b: (0, 0)),    # pm  (resident)
                pl.BlockSpec((1, Npad), lambda n, b: (0, 0)),    # keep(resident)
            ],
            out_specs=pl.BlockSpec((TB, TN), lambda n, b: (b, n)),
        ),
        compiler_params=pltpu.CompilerParams(
            dimension_semantics=("parallel", "parallel"),
            vmem_limit_bytes=vmem_limit),
    )(img_flat, pm_flat, keep_flat)

    if Npad != N:
        out_flat = out_flat[:, :N]
    return out_flat.reshape(B, C, H, W)


# ---------------------------------------------------------------------------
# Module setup glue (plain JAX): mask generation + MyRandomAffine
# ---------------------------------------------------------------------------
def generate_mask(patch_shape, patch_size):
    """Exact port of ApplyPatch._generate_mask, including the original module's
    index quirk (x-bounds from W applied to the H axis and vice versa)."""
    C, H, W = patch_shape
    mask = jnp.ones(patch_shape, dtype=jnp.float32)
    upp_l_x = W // 2 - patch_size // 2
    upp_l_y = H // 2 - patch_size // 2
    bott_r_x = W // 2 + patch_size // 2
    bott_r_y = H // 2 + patch_size // 2
    mask = mask.at[:, :upp_l_x, :].set(0.0)
    mask = mask.at[:, :, :upp_l_y].set(0.0)
    mask = mask.at[:, bott_r_x:, :].set(0.0)
    mask = mask.at[:, :, bott_r_y:].set(0.0)
    return mask


def random_affine(key, patch, mask,
                  rotation_range=45.0,
                  translation_range=(0.2, 0.2),
                  scale_range=(0.5, 1.0)):
    """MyRandomAffine: one sampled (angle, translate, scale) applied to both
    patch and mask, bilinear resampling, zero fill outside."""
    # TODO(synk): the affine grid-resample (gather-heavy map_coordinates on a
    # tiny CxHxW array) stays in plain JAX, not inside the Pallas kernel.
    C, H, W = patch.shape
    k1, k2, k3, k4 = jax.random.split(key, 4)
    angle = jax.random.uniform(k1, (), minval=-rotation_range,
                               maxval=rotation_range) * jnp.pi / 180.0
    tx = jax.random.uniform(k2, (), minval=-translation_range[0] * W,
                            maxval=translation_range[0] * W)
    ty = jax.random.uniform(k3, (), minval=-translation_range[1] * H,
                            maxval=translation_range[1] * H)
    scale = jax.random.uniform(k4, (), minval=scale_range[0],
                               maxval=scale_range[1])

    cx = (W - 1) / 2.0
    cy = (H - 1) / 2.0
    cos, sin = jnp.cos(angle), jnp.sin(angle)

    ys, xs = jnp.meshgrid(jnp.arange(H, dtype=jnp.float32),
                          jnp.arange(W, dtype=jnp.float32), indexing="ij")
    xd = xs - cx - tx
    yd = ys - cy - ty
    src_x = (cos * xd + sin * yd) / scale + cx
    src_y = (-sin * xd + cos * yd) / scale + cy

    def warp_channel(im):
        return jax.scipy.ndimage.map_coordinates(
            im, [src_y, src_x], order=1, mode="constant", cval=0.0)

    patch_t = jax.vmap(warp_channel)(patch)
    mask_t = jax.vmap(warp_channel)(mask)
    return patch_t, mask_t


# ---------------------------------------------------------------------------
# End-to-end ApplyPatch forward
# ---------------------------------------------------------------------------
def apply_patch_forward(img, patch, patch_size, key):
    mask = generate_mask(patch.shape, patch_size)
    patch_t, mask_t = random_affine(key, patch, mask)
    # Precompute (in f32, BEFORE any downcast) so the mask==0 test is exact and
    # the hot loop is a single select over the image batch.
    pm = patch_t * mask_t                           # patch contribution
    keep = jnp.where(mask_t == 0, 1.0, 0.0)         # 1 where the image shows
    return apply_patch_pallas(img, pm, keep)


def apply_patch_reference(img, patch, patch_size, key):
    """Pure-JAX reference for correctness checking (literal PyTorch formula)."""
    mask = generate_mask(patch.shape, patch_size)
    patch_t, mask_t = random_affine(key, patch, mask)
    inv_mask = jnp.where(mask_t == 0, 1.0, 0.0)
    return img * inv_mask[None] + patch_t[None] * mask_t[None]


if __name__ == "__main__":
    key = jax.random.PRNGKey(0)
    k_img, k_patch, k_affine = jax.random.split(key, 3)

    # Small synthetic shapes consistent with the module (C,H,W patch + NCHW img).
    B, C, H, W = 2, 3, 64, 64
    patch_size = 32

    img = jax.random.uniform(k_img, (B, C, H, W), dtype=jnp.float32)
    patch = jax.random.uniform(k_patch, (C, H, W), dtype=jnp.float32)

    out = apply_patch_forward(img, patch, patch_size, k_affine)
    out = jax.block_until_ready(out)

    ref = apply_patch_reference(img, patch, patch_size, k_affine)
    assert out.shape == (B, C, H, W)
    assert jnp.allclose(out, ref, atol=1e-5, rtol=1e-5)

    print("KERNEL_OK")
</pallas_src>

<mosaic_0001>
module attributes {stable_mosaic.version = 11 : i64} {
  func.func @_apply_patch_kernel(%arg0: i32, %arg1: i32, %arg2: memref<2x12288xf32, #tpu.memory_space<vmem>>, %arg3: memref<1x12288xf32, #tpu.memory_space<vmem>>, %arg4: memref<1x12288xf32, #tpu.memory_space<vmem>>, %arg5: memref<2x12288xf32, #tpu.memory_space<vmem>>) attributes {dimension_semantics = [#tpu.dimension_semantics<parallel>, #tpu.dimension_semantics<parallel>], iteration_bounds = array<i64: 1, 1>, scalar_prefetch = 0 : i64, scratch_operands = 0 : i64, tpu.core_type = #tpu.core_type<tc>, window_params = [{transform_indices = @transform_0, window_bounds = array<i64: 2, 12288>}, {pipeline_mode = #tpu.pipeline_mode<synchronous>, transform_indices = @transform_1, window_bounds = array<i64: 1, 12288>}, {pipeline_mode = #tpu.pipeline_mode<synchronous>, transform_indices = @transform_2, window_bounds = array<i64: 1, 12288>}, {transform_indices = @transform_3, window_bounds = array<i64: 2, 12288>}]} {
    %c12288_i32 = arith.constant 12288 : i32
    %0 = arith.muli %arg0, %c12288_i32 : i32
    %1 = tpu.assume_multiple %0, 128 : i32
    %c0 = arith.constant 0 : index
    %2 = arith.index_cast %1 : i32 to index
    %3 = vector.load %arg4[%c0, %2] : memref<1x12288xf32, #tpu.memory_space<vmem>>, vector<1x12288xf32>
    %c0_0 = arith.constant 0 : index
    %4 = arith.index_cast %1 : i32 to index
    %5 = vector.load %arg3[%c0_0, %4] : memref<1x12288xf32, #tpu.memory_space<vmem>>, vector<1x12288xf32>
    %cst = arith.constant 0.000000e+00 : f32
    %6 = vector.broadcast %cst : f32 to vector<1x12288xf32>
    %7 = arith.cmpf one, %3, %6 : vector<1x12288xf32>
    %c0_1 = arith.constant 0 : index
    %c0_2 = arith.constant 0 : index
    %8 = vector.load %arg2[%c0_1, %c0_2] : memref<2x12288xf32, #tpu.memory_space<vmem>>, vector<2x12288xf32>
    %9 = vector.shape_cast %7 : vector<1x12288xi1> to vector<1x12288xi1>
    %10 = vector.broadcast %9 : vector<1x12288xi1> to vector<2x12288xi1>
    %11 = vector.shape_cast %5 : vector<1x12288xf32> to vector<1x12288xf32>
    %12 = vector.broadcast %11 : vector<1x12288xf32> to vector<2x12288xf32>
    %13 = arith.select %10, %8, %12 : vector<2x12288xi1>, vector<2x12288xf32>
    %c0_3 = arith.constant 0 : index
    %c0_4 = arith.constant 0 : index
    %14 = vector.load %arg5[%c0_3, %c0_4] : memref<2x12288xf32, #tpu.memory_space<vmem>>, vector<2x12288xf32>
    tpu.vector_store %arg5[%c0_3, %c0_4], %13 {strides = array<i32>} : memref<2x12288xf32, #tpu.memory_space<vmem>>, vector<2x12288xf32>,
    return
  }
  func.func @transform_0(%arg0: i32, %arg1: i32) -> (i32, i32) {
    %c0_i32 = arith.constant 0 : i32
    return %arg1, %arg0 : i32, i32
  }
  func.func @transform_1(%arg0: i32, %arg1: i32) -> (i32, i32) {
    %c0_i32 = arith.constant 0 : i32
    %c0_i32_0 = arith.constant 0 : i32
    %c0_i32_1 = arith.constant 0 : i32
    return %c0_i32, %c0_i32_0 : i32, i32
  }
  func.func @transform_2(%arg0: i32, %arg1: i32) -> (i32, i32) {
    %c0_i32 = arith.constant 0 : i32
    %c0_i32_0 = arith.constant 0 : i32
    %c0_i32_1 = arith.constant 0 : i32
    return %c0_i32, %c0_i32_0 : i32, i32
  }
  func.func @transform_3(%arg0: i32, %arg1: i32) -> (i32, i32) {
    %c0_i32 = arith.constant 0 : i32
    return %arg1, %arg0 : i32, i32
  }
}

</mosaic_0001>

<bundles_post_ra>
// kernel: tpu_custom_call.1
= control target key start
LH: loop header
LB: loop body
LE: loop exit
PB: predicated region body
PF: predicated region fallthrough
CT: control target
= control target key end

     0   :  { %8 = vsyncpa [#allocation3], 0  ;;  %s3353_s0 = inlined_call_operand.hbm [shape: f32[2,12288], index: 0, kind: input, shape index: {}]   ;;  %s3354_s1 = inlined_call_operand.hbm [shape: f32[1,12288], index: 1, kind: input, shape index: {}]   ;;  %s3355_s2 = inlined_call_operand.hbm [shape: f32[1,12288], index: 2, kind: input, shape index: {}]   ;;  %s3356_s3 = inlined_call_operand.hbm [shape: f32[2,12288], index: 3, kind: output, shape index: {}]  }
   0x1   :  { %9 = vsyncpa [#allocation6], 0 }
   0x2   :  { %10 = vsyncpa [#allocation4], 0  ;;  %s2409_s12 = smov [#allocation5]   ;;  %s2410_s14 = smov [#allocation2]  }
   0x3   :  { %s27_s13 = sshll.u32 %s2409_s12, 4  ;;  %s17_s15 = sshll.u32 %s2410_s14, 4  ;;  %s28_s13 = int_to_ptr.vmem [resolvable:$true] %s27_s13  ;;  %s18_s15 = int_to_ptr.vmem [resolvable:$true] %s17_s15 }
   0x4   :  { %s2331_s16 = scalar_lea.vmem %s28_s13, 1536  ;;  %p2336_p1 = scmp.lt.s32.totalorder %s28_s13, %s28_s13 }
   0x5   :  { %p2332_p0 = scmp.ne.s32.totalorder %s28_s13, %s2331_s16  ;;  %p2337_p2 = scmp.lt.s32.totalorder %s2331_s16, %s2331_s16 }
   0x7   :  { %p2338_p3 = por %p2337_p2, %p2336_p1 }
   0x9   :  { %p2339_p4 = pnand %p2338_p3, %p2332_p0 }
   0xb   :  { %2342 = shalt.err (!%p2339_p4)
}
   0xc   :  { %30 = dma.hbm_to_vmem [thread:$0]  %s3354_s1, 1536, %s28_s13, [#allocation6]  }
   0xd   :  { %s2351_s19 = scalar_lea.vmem %s18_s15, 3072  ;;  %p2356_p6 = scmp.lt.s32.totalorder %s18_s15, %s18_s15 }
   0xe   :  { %p2352_p5 = scmp.ne.s32.totalorder %s18_s15, %s2351_s19  ;;  %p2357_p7 = scmp.lt.s32.totalorder %s2351_s19, %s2351_s19 }
  0x10   :  { %p2358_p8 = por %p2357_p7, %p2356_p6 }
  0x12   :  { %p2359_p9 = pnand %p2358_p8, %p2352_p5 }
  0x14   :  { %2362 = shalt.err (!%p2359_p9)
}
  0x15   :  { %20 = dma.hbm_to_vmem [thread:$0]  %s3353_s0, 3072, %s18_s15, [#allocation3]  }
  0x16   :  { %s2411_s22 = smov [#allocation7]  }
  0x17   :  { %s37_s23 = sshll.u32 %s2411_s22, 4  ;;  %s38_s23 = int_to_ptr.vmem [resolvable:$true] %s37_s23 }
  0x18   :  { %s2371_s24 = scalar_lea.vmem %s38_s23, 1536  ;;  %p2376_p11 = scmp.lt.s32.totalorder %s38_s23, %s38_s23 }
  0x19   :  { %p2372_p10 = scmp.ne.s32.totalorder %s38_s23, %s2371_s24  ;;  %p2377_p12 = scmp.lt.s32.totalorder %s2371_s24, %s2371_s24 }
  0x1b   :  { %p2378_p13 = por %p2377_p12, %p2376_p11 }
  0x1d   :  { %p2379_p0 = pnand %p2378_p13, %p2372_p10 }
  0x1f   :  { %2382 = shalt.err (!%p2379_p0)
}
  0x20   :  { %40 = dma.hbm_to_vmem [thread:$0]  %s3355_s2, 1536, %s38_s23, [#allocation6]  }
  0x21   :  { %2403 = dma.done.wait [#allocation3], 3072  }
  0x22   :  { %2404 = vsyncadd [#allocation3], 4294964224 }
  0x23   :  { %2405 = dma.done.wait [#allocation6], 3072  }
  0x24   :  { %2406 = vsyncadd [#allocation6], 4294964224  ;;  %v127_v0 = vlaneseq  ;;  %v2412_v1 = vmov 1983009808   ;;  %v54_v11 = vld [vmem:[#allocation7] sm:$0xff]  ;;  %v2413_v20 = vmov 0  }
  0x25   :  { %v1125_v2 = vunpack.c.l.s4 %v2412_v1  ;;  %v2456_v12 = vld [vmem:[#allocation5] sm:$0xff]  ;;  %vm79_vm0 = vcmp.ne.f32.partialorder %v54_v11, 0.0  ;;  %v92_v38 = vld [vmem:[#allocation2 + $0x8] sm:$0xff]  ;;  %v93_v11 = vld [vmem:[#allocation2 + $0x10] sm:$0xff]  ;;  %s2414_s0 = smov [#allocation8]  }
  0x26   :  { %v128_v3 = vshrl.u32 %v127_v0, 7  ;;  %v91_v13 = vld [vmem:[#allocation2] sm:$0xff]  ;;  %v115_v21 = vsel %vm79_vm0, 1, %v2413_v20  ;;  %v55_v45 = vld [vmem:[#allocation7 + $0x8] sm:$0xff]  ;;  %v1140_v53 = vcombine.high %v92_v38, %v92_v38  ;;  %s2281_s2 = sshll.u32 %s2414_s0, 4  ;;  %s2282_s2 = int_to_ptr.vmem [resolvable:$true] %s2281_s2 }
  0x27   :  { %v1126_v4 = vunpack.c.0.s8 %v1125_v2  ;;  %v1123_v23 = vcombine.high %v91_v13, %v91_v13  ;;  %v2493_v46 = vld [vmem:[#allocation5 + $0x8] sm:$0xff]  ;;  %vm80_vm9 = vcmp.ne.f32.partialorder %v55_v45, 0.0  ;;  %v56_v45 = vld [vmem:[#allocation7 + $0x10] sm:$0xff]  ;;  %s2383_s26 = scalar_lea.vmem %s2282_s2, 3072  ;;  %p2388_p2 = scmp.lt.s32.totalorder %s2282_s2, %s2282_s2 }
  0x28   :  { %v2444_v5 = vsub.s32 0, %v128_v3  ;;  %v2446_v6 = vsub.s32 1, %v128_v3  ;;  %v2448_v7 = vsub.s32 2, %v128_v3  ;;  %v2450_v8 = vsub.s32 3, %v128_v3  ;;  %p2384_p1 = scmp.ne.s32.totalorder %s2282_s2, %s2383_s26  ;;  %p2389_p3 = scmp.lt.s32.totalorder %s2383_s26, %s2383_s26 }
  0x29   :  { %v2452_v9 = vsub.s32 %v1126_v4, %v128_v3  ;;  %v2454_v10 = vsub.s32 4, %v128_v3  ;;  %v2458_v14 = vsub.s32 5, %v128_v3  ;;  %v2460_v15 = vsub.s32 6, %v128_v3 }
  0x2a   :  { %v2462_v16 = vsub.s32 7, %v128_v3  ;;  %v622_v17 = vrot.slane %v2456_v12, %v2444_v5  ;;  %v626_v18 = vrot.slane %v2456_v12, %v2446_v6  ;;  %v630_v19 = vrot.slane %v2456_v12, %v2448_v7  ;;  %p2390_p4 = por %p2389_p3, %p2388_p2 }
  0x2b   :  { %v634_v22 = vrot.slane %v2456_v12, %v2450_v8  ;;  %v1130_v24 = vrot.slane %v91_v13, %v2452_v9  ;;  %v130_v25 = vrot.slane %v115_v21, %v2444_v5  ;;  %v134_v26 = vrot.slane %v115_v21, %v2446_v6 }
  0x2c   :  { %v138_v27 = vrot.slane %v115_v21, %v2448_v7  ;;  %v142_v28 = vrot.slane %v115_v21, %v2450_v8  ;;  %v1137_v29 = vrot.slane %v1123_v23, %v2452_v9  ;;  %v146_v31 = vrot.slane %v115_v21, %v2454_v10  ;;  %p2391_p5 = pnand %p2390_p4, %p2384_p1 }
  0x2d   :  { %v1138_v30 = vcombine.high %v1130_v24, %v1130_v24  ;;  %v150_v32 = vrot.slane %v115_v21, %v2458_v14  ;;  %vm511_vm1 = vcmp.eq.s32.totalorder %v130_v25, 1  ;;  %vm512_vm2 = vcmp.eq.s32.totalorder %v134_v26, 1 }
  0x2e   :  { %vm513_vm3 = vcmp.eq.s32.totalorder %v138_v27, 1  ;;  %vm514_vm4 = vcmp.eq.s32.totalorder %v142_v28, 1  ;;  %v1139_v33 = vcombine.high %v1137_v29, %v1137_v29  ;;  %v1627_v34 = vsel %vm511_vm1, %v1130_v24, %v622_v17 }
  0x2f   :  { %v1628_v35 = vsel %vm512_vm2, %v1138_v30, %v626_v18  ;;  %v1629_v36 = vsel %vm513_vm3, %v1137_v29, %v630_v19  ;;  %v154_v39 = vrot.slane %v115_v21, %v2460_v15  ;;  %v158_v40 = vrot.slane %v115_v21, %v2462_v16 }
  0x30   :  { %v1819_v37 = vcombine.low %v1627_v34, %v1628_v35  ;;  %v1630_v41 = vsel %vm514_vm4, %v1139_v33, %v634_v22  ;;  %vm2483_vm5 = vcmp.eq.s32.totalorder %v146_v31, 1  ;;  %vm2487_vm6 = vcmp.eq.s32.totalorder %v150_v32, 1 }
  0x31   :  { %v638_v44 = vrot.slane %v2456_v12, %v2454_v10  ;;  %v1820_v47 = vcombine.low %v1629_v36, %v1630_v41  ;;  %vm2496_vm7 = vcmp.eq.s32.totalorder %v154_v39, 1  ;;  %v642_v50 = vrot.slane %v2456_v12, %v2458_v14 }
  0x32   :  { %v1827_v48 = vrot.slane %v1819_v37, %v2452_v9  ;;  %vm2502_vm8 = vcmp.eq.s32.totalorder %v158_v40, 1  ;;  %v646_v52 = vrot.slane %v2456_v12, %v2460_v15  ;;  %v1147_v54 = vrot.slane %v92_v38, %v2452_v9  ;;  %v94_v37 = vld [vmem:[#allocation2 + $0x18] sm:$0xff]  ;;  %v96_v40 = vld [vmem:[#allocation2 + $0x28] sm:$0xff] }
  0x33   :  { %v1834_v55 = vrot.slane %v1820_v47, %v2452_v9  ;;  %v650_v56 = vrot.slane %v2456_v12, %v2462_v16  ;;  %v654_v57 = vrot.slane %v2493_v46, %v2444_v5  ;;  %v1154_v58 = vrot.slane %v1140_v53, %v2452_v9 }
  0x34   :  { %v1155_v59 = vcombine.high %v1147_v54, %v1147_v54  ;;  %v1631_v60 = vsel %vm2483_vm5, %v1147_v54, %v638_v44  ;;  %v116_v61 = vsel %vm80_vm9, 1, %v2413_v20  ;;  %v658_v12 = vrot.slane %v2493_v46, %v2446_v6 }
  0x35   :  { %v1835_v62 = vcombine.low %v1827_v48, %v1834_v55  ;;  %v162_v63 = vrot.slane %v116_v61, %v2444_v5  ;;  %v166_v0 = vrot.slane %v116_v61, %v2446_v6  ;;  %v170_v1 = vrot.slane %v116_v61, %v2448_v7 }
  0x36   :  { %v1156_v2 = vcombine.high %v1154_v58, %v1154_v58  ;;  %v1632_v3 = vsel %vm2487_vm6, %v1155_v59, %v642_v50  ;;  %v1633_v4 = vsel %vm2496_vm7, %v1154_v58, %v646_v52  ;;  %v174_v17 = vrot.slane %v116_v61, %v2450_v8 }
  0x37   :  { %2251 = vst [vmem:[#allocation8] sm:$0xff] %v1835_v62  ;;  %v1836_v13 = vcombine.low %v1631_v60, %v1632_v3  ;;  %vm2528_vm10 = vcmp.eq.s32.totalorder %v162_v63, 1  ;;  %vm2532_vm11 = vcmp.eq.s32.totalorder %v166_v0, 1  ;;  %vm2538_vm12 = vcmp.eq.s32.totalorder %v170_v1, 1 }
  0x38   :  { %v1634_v21 = vsel %vm2502_vm8, %v1156_v2, %v650_v56  ;;  %v662_v23 = vrot.slane %v2493_v46, %v2448_v7  ;;  %v666_v24 = vrot.slane %v2493_v46, %v2450_v8  ;;  %v1157_v27 = vcombine.high %v93_v11, %v93_v11 }
  0x39   :  { %v1837_v25 = vcombine.low %v1633_v4, %v1634_v21  ;;  %v1844_v26 = vrot.slane %v1836_v13, %v2452_v9  ;;  %v1164_v28 = vrot.slane %v93_v11, %v2452_v9  ;;  %v178_v29 = vrot.slane %v116_v61, %v2454_v10 }
  0x3a   :  { %v182_v30 = vrot.slane %v116_v61, %v2458_v14  ;;  %v186_v31 = vrot.slane %v116_v61, %v2460_v15  ;;  %v190_v32 = vrot.slane %v116_v61, %v2462_v16  ;;  %v1171_v34 = vrot.slane %v1157_v27, %v2452_v9  ;;  %v2589_v61 = vld [vmem:[#allocation5 + $0x10] sm:$0xff] }
  0x3b   :  { %v1851_v33 = vrot.slane %v1837_v25, %v2452_v9  ;;  %v1172_v35 = vcombine.high %v1164_v28, %v1164_v28  ;;  %v1635_v36 = vsel %vm2528_vm10, %v1164_v28, %v654_v57  ;;  %vm522_vm13 = vcmp.eq.s32.totalorder %v174_v17, 1  ;;  %v95_v17 = vld [vmem:[#allocation2 + $0x20] sm:$0xff] }
  0x3c   :  { %vm2556_vm14 = vcmp.eq.s32.totalorder %v178_v29, 1  ;;  %vm2560_vm15 = vcmp.eq.s32.totalorder %v182_v30, 1  ;;  %vm2564_vm0 = vcmp.eq.s32.totalorder %v186_v31, 1  ;;  %v1173_v42 = vcombine.high %v1171_v34, %v1171_v34 }
  0x3d   :  { %v1852_v41 = vcombine.low %v1844_v26, %v1851_v33  ;;  %v1636_v43 = vsel %vm2532_vm11, %v1172_v35, %v658_v12  ;;  %v1637_v44 = vsel %vm2538_vm12, %v1171_v34, %v662_v23  ;;  %vm2572_vm1 = vcmp.eq.s32.totalorder %v190_v32, 1 }
  0x3e   :  { %v1853_v47 = vcombine.low %v1635_v36, %v1636_v43  ;;  %v670_v49 = vrot.slane %v2493_v46, %v2454_v10  ;;  %v674_v50 = vrot.slane %v2493_v46, %v2458_v14  ;;  %v1638_v51 = vsel %vm522_vm13, %v1173_v42, %v666_v24  ;;  %v98_v43 = vld [vmem:[#allocation2 + $0x38] sm:$0xff] }
  0x3f   :  { %2252 = vst [vmem:[#allocation8 + $0x8] sm:$0xff] %v1852_v41  ;;  %v678_v52 = vrot.slane %v2493_v46, %v2460_v15  ;;  %v1174_v53 = vcombine.high %v94_v37, %v94_v37  ;;  %v1181_v54 = vrot.slane %v94_v37, %v2452_v9  ;;  %v1854_v55 = vcombine.low %v1637_v44, %v1638_v51  ;;  %v58_v51 = vld [vmem:[#allocation7 + $0x20] sm:$0xff] }
  0x40   :  { %v1861_v56 = vrot.slane %v1853_v47, %v2452_v9  ;;  %v682_v57 = vrot.slane %v2493_v46, %v2462_v16  ;;  %vm81_vm2 = vcmp.ne.f32.partialorder %v56_v45, 0.0  ;;  %v686_v19 = vrot.slane %v2589_v61, %v2444_v5  ;;  %v57_v47 = vld [vmem:[#allocation7 + $0x18] sm:$0xff]  ;;  %v100_v45 = vld [vmem:[#allocation2 + $0x48] sm:$0xff] }
  0x41   :  { %v1188_v58 = vrot.slane %v1174_v53, %v2452_v9  ;;  %v1189_v59 = vcombine.high %v1181_v54, %v1181_v54  ;;  %v1639_v60 = vsel %vm2556_vm14, %v1181_v54, %v670_v49  ;;  %v117_v62 = vsel %vm81_vm2, 1, %v2413_v20 }
  0x42   :  { %v1868_v63 = vrot.slane %v1854_v55, %v2452_v9  ;;  %v194_v0 = vrot.slane %v117_v62, %v2444_v5  ;;  %v198_v1 = vrot.slane %v117_v62, %v2446_v6  ;;  %v202_v2 = vrot.slane %v117_v62, %v2448_v7 }
  0x43   :  { %v1190_v46 = vcombine.high %v1188_v58, %v1188_v58  ;;  %v1640_v3 = vsel %vm2560_vm15, %v1189_v59, %v674_v50  ;;  %v1641_v4 = vsel %vm2564_vm0, %v1188_v58, %v678_v52  ;;  %v206_v11 = vrot.slane %v117_v62, %v2450_v8 }
  0x44   :  { %v1869_v12 = vcombine.low %v1861_v56, %v1868_v63  ;;  %v1870_v13 = vcombine.low %v1639_v60, %v1640_v3  ;;  %vm2601_vm3 = vcmp.eq.s32.totalorder %v194_v0, 1  ;;  %vm2609_vm4 = vcmp.eq.s32.totalorder %v198_v1, 1  ;;  %v2670_v63 = vld [vmem:[#allocation5 + $0x18] sm:$0xff] }
  0x45   :  { %v1642_v21 = vsel %vm2572_vm1, %v1190_v46, %v682_v57  ;;  %vm2613_vm5 = vcmp.eq.s32.totalorder %v202_v2, 1  ;;  %vm2617_vm6 = vcmp.eq.s32.totalorder %v206_v11, 1  ;;  %v690_v27 = vrot.slane %v2589_v61, %v2446_v6 }
  0x46   :  { %2253 = vst [vmem:[#allocation8 + $0x10] sm:$0xff] %v1869_v12  ;;  %v1871_v25 = vcombine.low %v1641_v4, %v1642_v21  ;;  %v1878_v26 = vrot.slane %v1870_v13, %v2452_v9  ;;  %v694_v28 = vrot.slane %v2589_v61, %v2448_v7  ;;  %v1191_v29 = vcombine.high %v95_v17, %v95_v17 }
  0x47   :  { %v1198_v30 = vrot.slane %v95_v17, %v2452_v9  ;;  %v210_v31 = vrot.slane %v117_v62, %v2454_v10  ;;  %v214_v32 = vrot.slane %v117_v62, %v2458_v14  ;;  %v698_v34 = vrot.slane %v2589_v61, %v2450_v8  ;;  %v97_v17 = vld [vmem:[#allocation2 + $0x30] sm:$0xff] }
  0x48   :  { %v1885_v33 = vrot.slane %v1871_v25, %v2452_v9  ;;  %v218_v35 = vrot.slane %v117_v62, %v2460_v15  ;;  %v222_v36 = vrot.slane %v117_v62, %v2462_v16  ;;  %v1205_v37 = vrot.slane %v1191_v29, %v2452_v9 }
  0x49   :  { %v1206_v38 = vcombine.high %v1198_v30, %v1198_v30  ;;  %v1643_v39 = vsel %vm2601_vm3, %v1198_v30, %v686_v19  ;;  %v702_v41 = vrot.slane %v2589_v61, %v2454_v10  ;;  %vm2639_vm7 = vcmp.eq.s32.totalorder %v210_v31, 1 }
  0x4a   :  { %v1886_v42 = vcombine.low %v1878_v26, %v1885_v33  ;;  %vm2643_vm8 = vcmp.eq.s32.totalorder %v214_v32, 1  ;;  %vm2647_vm9 = vcmp.eq.s32.totalorder %v218_v35, 1  ;;  %v1207_v48 = vcombine.high %v1205_v37, %v1205_v37 }
  0x4b   :  { %v1644_v49 = vsel %vm2609_vm4, %v1206_v38, %v690_v27  ;;  %v1645_v50 = vsel %vm2613_vm5, %v1205_v37, %v694_v28  ;;  %vm2655_vm10 = vcmp.eq.s32.totalorder %v222_v36, 1  ;;  %v706_v53 = vrot.slane %v2589_v61, %v2458_v14 }
  0x4c   :  { %2254 = vst [vmem:[#allocation8 + $0x18] sm:$0xff] %v1886_v42  ;;  %v1887_v52 = vcombine.low %v1643_v39, %v1644_v49  ;;  %v710_v54 = vrot.slane %v2589_v61, %v2460_v15  ;;  %v1208_v55 = vcombine.high %v96_v40, %v96_v40  ;;  %v1646_v56 = vsel %vm2617_vm6, %v1207_v48, %v698_v34 }
  0x4d   :  { %v714_v57 = vrot.slane %v2589_v61, %v2462_v16  ;;  %v1215_v58 = vrot.slane %v96_v40, %v2452_v9  ;;  %vm82_vm11 = vcmp.ne.f32.partialorder %v57_v47, 0.0  ;;  %v1888_v59 = vcombine.low %v1645_v50, %v1646_v56 }
  0x4e   :  { %v1895_v60 = vrot.slane %v1887_v52, %v2452_v9  ;;  %v1222_v62 = vrot.slane %v1208_v55, %v2452_v9  ;;  %v118_v0 = vsel %vm82_vm11, 1, %v2413_v20  ;;  %v718_v21 = vrot.slane %v2670_v63, %v2444_v5 }
  0x4f   :  { %v1223_v1 = vcombine.high %v1215_v58, %v1215_v58  ;;  %v1647_v2 = vsel %vm2639_vm7, %v1215_v58, %v702_v41  ;;  %v226_v46 = vrot.slane %v118_v0, %v2444_v5  ;;  %v230_v61 = vrot.slane %v118_v0, %v2446_v6 }
  0x50   :  { %v1902_v3 = vrot.slane %v1888_v59, %v2452_v9  ;;  %v1224_v4 = vcombine.high %v1222_v62, %v1222_v62  ;;  %v1649_v11 = vsel %vm2647_vm9, %v1222_v62, %v710_v54  ;;  %v234_v12 = vrot.slane %v118_v0, %v2448_v7 }
  0x51   :  { %v1648_v13 = vsel %vm2643_vm8, %v1223_v1, %v706_v53  ;;  %v238_v18 = vrot.slane %v118_v0, %v2450_v8  ;;  %vm2684_vm12 = vcmp.eq.s32.totalorder %v226_v46, 1  ;;  %vm2692_vm13 = vcmp.eq.s32.totalorder %v230_v61, 1  ;;  %v2749_v61 = vld [vmem:[#allocation5 + $0x20] sm:$0xff] }
  0x52   :  { %v1903_v22 = vcombine.low %v1895_v60, %v1902_v3  ;;  %v1650_v23 = vsel %vm2655_vm10, %v1224_v4, %v714_v57  ;;  %v1904_v24 = vcombine.low %v1647_v2, %v1648_v13  ;;  %vm2696_vm14 = vcmp.eq.s32.totalorder %v234_v12, 1 }
  0x53   :  { %v1905_v26 = vcombine.low %v1649_v11, %v1650_v23  ;;  %v722_v28 = vrot.slane %v2670_v63, %v2446_v6  ;;  %v726_v29 = vrot.slane %v2670_v63, %v2448_v7  ;;  %v730_v31 = vrot.slane %v2670_v63, %v2450_v8  ;;  %v99_v23 = vld [vmem:[#allocation2 + $0x40] sm:$0xff] }
  0x54   :  { %2255 = vst [vmem:[#allocation8 + $0x20] sm:$0xff] %v1903_v22  ;;  %v1912_v30 = vrot.slane %v1904_v24, %v2452_v9  ;;  %v1225_v32 = vcombine.high %v97_v17, %v97_v17  ;;  %v1232_v33 = vrot.slane %v97_v17, %v2452_v9  ;;  %v242_v35 = vrot.slane %v118_v0, %v2454_v10 }
  0x55   :  { %v1919_v34 = vrot.slane %v1905_v26, %v2452_v9  ;;  %v246_v36 = vrot.slane %v118_v0, %v2458_v14  ;;  %v250_v37 = vrot.slane %v118_v0, %v2460_v15  ;;  %v254_v41 = vrot.slane %v118_v0, %v2462_v16 }
  0x56   :  { %v1239_v38 = vrot.slane %v1225_v32, %v2452_v9  ;;  %v1240_v39 = vcombine.high %v1232_v33, %v1232_v33  ;;  %v1651_v40 = vsel %vm2684_vm12, %v1232_v33, %v718_v21  ;;  %vm538_vm15 = vcmp.eq.s32.totalorder %v238_v18, 1 }
  0x57   :  { %v1920_v42 = vcombine.low %v1912_v30, %v1919_v34  ;;  %vm2716_vm0 = vcmp.eq.s32.totalorder %v242_v35, 1  ;;  %vm2720_vm1 = vcmp.eq.s32.totalorder %v246_v36, 1  ;;  %vm2728_vm2 = vcmp.eq.s32.totalorder %v250_v37, 1 }
  0x58   :  { %v1241_v47 = vcombine.high %v1239_v38, %v1239_v38  ;;  %v1652_v48 = vsel %vm2692_vm13, %v1240_v39, %v722_v28  ;;  %v1653_v49 = vsel %vm2696_vm14, %v1239_v38, %v726_v29  ;;  %vm2732_vm3 = vcmp.eq.s32.totalorder %v254_v41, 1 }
  0x59   :  { %2256 = vst [vmem:[#allocation8 + $0x28] sm:$0xff] %v1920_v42  ;;  %v1921_v52 = vcombine.low %v1651_v40, %v1652_v48  ;;  %v734_v54 = vrot.slane %v2670_v63, %v2454_v10  ;;  %v738_v55 = vrot.slane %v2670_v63, %v2458_v14  ;;  %v742_v57 = vrot.slane %v2670_v63, %v2460_v15 }
  0x5a   :  { %v1654_v56 = vsel %vm538_vm15, %v1241_v47, %v730_v31  ;;  %v1242_v58 = vcombine.high %v98_v43, %v98_v43  ;;  %v1249_v59 = vrot.slane %v98_v43, %v2452_v9  ;;  %v746_v0 = vrot.slane %v2670_v63, %v2462_v16 }
  0x5b   :  { %v1922_v60 = vcombine.low %v1653_v49, %v1654_v56  ;;  %v1929_v62 = vrot.slane %v1921_v52, %v2452_v9  ;;  %vm83_vm4 = vcmp.ne.f32.partialorder %v58_v51, 0.0  ;;  %v750_v25 = vrot.slane %v2749_v61, %v2444_v5  ;;  %v59_v52 = vld [vmem:[#allocation7 + $0x28] sm:$0xff]  ;;  %v102_v49 = vld [vmem:[#allocation2 + $0x58] sm:$0xff]  ;;  %v60_v56 = vld [vmem:[#allocation7 + $0x30] sm:$0xff] }
  0x5c   :  { %v1256_v1 = vrot.slane %v1242_v58, %v2452_v9  ;;  %v1257_v2 = vcombine.high %v1249_v59, %v1249_v59  ;;  %v1655_v46 = vsel %vm2716_vm0, %v1249_v59, %v734_v54  ;;  %v119_v3 = vsel %vm83_vm4, 1, %v2413_v20  ;;  %v104_v51 = vld [vmem:[#allocation2 + $0x68] sm:$0xff] }
  0x5d   :  { %v1936_v4 = vrot.slane %v1922_v60, %v2452_v9  ;;  %v258_v11 = vrot.slane %v119_v3, %v2444_v5  ;;  %v262_v12 = vrot.slane %v119_v3, %v2446_v6  ;;  %v266_v13 = vrot.slane %v119_v3, %v2448_v7 }
  0x5e   :  { %v1258_v63 = vcombine.high %v1256_v1, %v1256_v1  ;;  %v1656_v17 = vsel %vm2720_vm1, %v1257_v2, %v738_v55  ;;  %v1657_v18 = vsel %vm2728_vm2, %v1256_v1, %v742_v57  ;;  %v270_v19 = vrot.slane %v119_v3, %v2450_v8 }
  0x5f   :  { %v1937_v21 = vcombine.low %v1929_v62, %v1936_v4  ;;  %v1938_v22 = vcombine.low %v1655_v46, %v1656_v17  ;;  %vm2761_vm5 = vcmp.eq.s32.totalorder %v258_v11, 1  ;;  %vm2769_vm6 = vcmp.eq.s32.totalorder %v262_v12, 1  ;;  %v2830_v4 = vld [vmem:[#allocation5 + $0x28] sm:$0xff] }
  0x60   :  { %v1658_v26 = vsel %vm2732_vm3, %v1258_v63, %v746_v0  ;;  %vm2773_vm7 = vcmp.eq.s32.totalorder %v266_v13, 1  ;;  %vm2777_vm8 = vcmp.eq.s32.totalorder %v270_v19, 1  ;;  %v754_v32 = vrot.slane %v2749_v61, %v2446_v6 }
  0x61   :  { %2257 = vst [vmem:[#allocation8 + $0x30] sm:$0xff] %v1937_v21  ;;  %v1939_v30 = vcombine.low %v1657_v18, %v1658_v26  ;;  %v1946_v31 = vrot.slane %v1938_v22, %v2452_v9  ;;  %v758_v33 = vrot.slane %v2749_v61, %v2448_v7  ;;  %v1259_v34 = vcombine.high %v99_v23, %v99_v23 }
  0x62   :  { %v1266_v35 = vrot.slane %v99_v23, %v2452_v9  ;;  %v274_v36 = vrot.slane %v119_v3, %v2454_v10  ;;  %v278_v37 = vrot.slane %v119_v3, %v2458_v14  ;;  %v762_v39 = vrot.slane %v2749_v61, %v2450_v8  ;;  %v101_v23 = vld [vmem:[#allocation2 + $0x50] sm:$0xff] }
  0x63   :  { %v1953_v38 = vrot.slane %v1939_v30, %v2452_v9  ;;  %v282_v40 = vrot.slane %v119_v3, %v2460_v15  ;;  %v286_v41 = vrot.slane %v119_v3, %v2462_v16  ;;  %v1273_v42 = vrot.slane %v1259_v34, %v2452_v9 }
  0x64   :  { %v1274_v43 = vcombine.high %v1266_v35, %v1266_v35  ;;  %v1659_v44 = vsel %vm2761_vm5, %v1266_v35, %v750_v25  ;;  %v766_v47 = vrot.slane %v2749_v61, %v2454_v10  ;;  %vm2799_vm9 = vcmp.eq.s32.totalorder %v274_v36, 1 }
  0x65   :  { %v1954_v48 = vcombine.low %v1946_v31, %v1953_v38  ;;  %vm2803_vm10 = vcmp.eq.s32.totalorder %v278_v37, 1  ;;  %vm2807_vm11 = vcmp.eq.s32.totalorder %v282_v40, 1  ;;  %v1275_v53 = vcombine.high %v1273_v42, %v1273_v42 }
  0x66   :  { %v1660_v54 = vsel %vm2769_vm6, %v1274_v43, %v754_v32  ;;  %v1661_v55 = vsel %vm2773_vm7, %v1273_v42, %v758_v33  ;;  %vm2815_vm12 = vcmp.eq.s32.totalorder %v286_v41, 1  ;;  %v770_v58 = vrot.slane %v2749_v61, %v2458_v14 }
  0x67   :  { %2258 = vst [vmem:[#allocation8 + $0x38] sm:$0xff] %v1954_v48  ;;  %v1955_v57 = vcombine.low %v1659_v44, %v1660_v54  ;;  %v774_v59 = vrot.slane %v2749_v61, %v2460_v15  ;;  %v1276_v60 = vcombine.high %v100_v45, %v100_v45  ;;  %v1662_v62 = vsel %vm2777_vm8, %v1275_v53, %v762_v39 }
  0x68   :  { %v778_v0 = vrot.slane %v2749_v61, %v2462_v16  ;;  %v1283_v1 = vrot.slane %v100_v45, %v2452_v9  ;;  %vm84_vm13 = vcmp.ne.f32.partialorder %v59_v52, 0.0  ;;  %v1956_v2 = vcombine.low %v1661_v55, %v1662_v62 }
  0x69   :  { %v1963_v46 = vrot.slane %v1955_v57, %v2452_v9  ;;  %v1290_v3 = vrot.slane %v1276_v60, %v2452_v9  ;;  %v120_v11 = vsel %vm84_vm13, 1, %v2413_v20  ;;  %v782_v26 = vrot.slane %v2830_v4, %v2444_v5 }
  0x6a   :  { %v1291_v12 = vcombine.high %v1283_v1, %v1283_v1  ;;  %v1663_v13 = vsel %vm2799_vm9, %v1283_v1, %v766_v47  ;;  %v290_v63 = vrot.slane %v120_v11, %v2444_v5  ;;  %v294_v61 = vrot.slane %v120_v11, %v2446_v6 }
  0x6b   :  { %v1970_v17 = vrot.slane %v1956_v2, %v2452_v9  ;;  %v1292_v18 = vcombine.high %v1290_v3, %v1290_v3  ;;  %v1665_v19 = vsel %vm2807_vm11, %v1290_v3, %v774_v59  ;;  %v298_v21 = vrot.slane %v120_v11, %v2448_v7 }
  0x6c   :  { %v1664_v22 = vsel %vm2803_vm10, %v1291_v12, %v770_v58  ;;  %v302_v24 = vrot.slane %v120_v11, %v2450_v8  ;;  %vm2844_vm14 = vcmp.eq.s32.totalorder %v290_v63, 1  ;;  %vm2852_vm15 = vcmp.eq.s32.totalorder %v294_v61, 1  ;;  %v2909_v61 = vld [vmem:[#allocation5 + $0x30] sm:$0xff] }
  0x6d   :  { %v1971_v27 = vcombine.low %v1963_v46, %v1970_v17  ;;  %v1666_v28 = vsel %vm2815_vm12, %v1292_v18, %v778_v0  ;;  %v1972_v29 = vcombine.low %v1663_v13, %v1664_v22  ;;  %vm2856_vm0 = vcmp.eq.s32.totalorder %v298_v21, 1 }
  0x6e   :  { %v1973_v31 = vcombine.low %v1665_v19, %v1666_v28  ;;  %v786_v33 = vrot.slane %v2830_v4, %v2446_v6  ;;  %v790_v34 = vrot.slane %v2830_v4, %v2448_v7  ;;  %v794_v36 = vrot.slane %v2830_v4, %v2450_v8  ;;  %v103_v28 = vld [vmem:[#allocation2 + $0x60] sm:$0xff] }
  0x6f   :  { %2259 = vst [vmem:[#allocation8 + $0x40] sm:$0xff] %v1971_v27  ;;  %v1980_v35 = vrot.slane %v1972_v29, %v2452_v9  ;;  %v1293_v37 = vcombine.high %v101_v23, %v101_v23  ;;  %v1300_v38 = vrot.slane %v101_v23, %v2452_v9  ;;  %v306_v40 = vrot.slane %v120_v11, %v2454_v10 }
  0x70   :  { %v1987_v39 = vrot.slane %v1973_v31, %v2452_v9  ;;  %v310_v41 = vrot.slane %v120_v11, %v2458_v14  ;;  %v314_v42 = vrot.slane %v120_v11, %v2460_v15  ;;  %v318_v47 = vrot.slane %v120_v11, %v2462_v16 }
  0x71   :  { %v1307_v43 = vrot.slane %v1293_v37, %v2452_v9  ;;  %v1308_v44 = vcombine.high %v1300_v38, %v1300_v38  ;;  %v1667_v45 = vsel %vm2844_vm14, %v1300_v38, %v782_v26  ;;  %vm554_vm1 = vcmp.eq.s32.totalorder %v302_v24, 1 }
  0x72   :  { %v1988_v48 = vcombine.low %v1980_v35, %v1987_v39  ;;  %vm2876_vm2 = vcmp.eq.s32.totalorder %v306_v40, 1  ;;  %vm2880_vm3 = vcmp.eq.s32.totalorder %v310_v41, 1  ;;  %vm2888_vm4 = vcmp.eq.s32.totalorder %v314_v42, 1 }
  0x73   :  { %v1309_v52 = vcombine.high %v1307_v43, %v1307_v43  ;;  %v1668_v53 = vsel %vm2852_vm15, %v1308_v44, %v786_v33  ;;  %v1669_v54 = vsel %vm2856_vm0, %v1307_v43, %v790_v34  ;;  %vm2892_vm5 = vcmp.eq.s32.totalorder %v318_v47, 1 }
  0x74   :  { %2260 = vst [vmem:[#allocation8 + $0x48] sm:$0xff] %v1988_v48  ;;  %v1989_v57 = vcombine.low %v1667_v45, %v1668_v53  ;;  %v798_v59 = vrot.slane %v2830_v4, %v2454_v10  ;;  %v802_v60 = vrot.slane %v2830_v4, %v2458_v14  ;;  %v806_v0 = vrot.slane %v2830_v4, %v2460_v15 }
  0x75   :  { %v1670_v62 = vsel %vm554_vm1, %v1309_v52, %v794_v36  ;;  %v1310_v1 = vcombine.high %v102_v49, %v102_v49  ;;  %v1317_v2 = vrot.slane %v102_v49, %v2452_v9  ;;  %v810_v11 = vrot.slane %v2830_v4, %v2462_v16 }
  0x76   :  { %v1990_v46 = vcombine.low %v1669_v54, %v1670_v62  ;;  %v1997_v3 = vrot.slane %v1989_v57, %v2452_v9  ;;  %vm85_vm6 = vcmp.ne.f32.partialorder %v60_v56, 0.0  ;;  %v814_v30 = vrot.slane %v2909_v61, %v2444_v5  ;;  %v61_v57 = vld [vmem:[#allocation7 + $0x38] sm:$0xff]  ;;  %v62_v62 = vld [vmem:[#allocation7 + $0x40] sm:$0xff]  ;;  %v108_v56 = vld [vmem:[#allocation2 + $0x88] sm:$0xff] }
  0x77   :  { %v1324_v12 = vrot.slane %v1310_v1, %v2452_v9  ;;  %v1325_v13 = vcombine.high %v1317_v2, %v1317_v2  ;;  %v1671_v63 = vsel %vm2876_vm2, %v1317_v2, %v798_v59  ;;  %v121_v17 = vsel %vm85_vm6, 1, %v2413_v20  ;;  %v106_v54 = vld [vmem:[#allocation2 + $0x78] sm:$0xff] }
  0x78   :  { %v2004_v18 = vrot.slane %v1990_v46, %v2452_v9  ;;  %v322_v19 = vrot.slane %v121_v17, %v2444_v5  ;;  %v326_v21 = vrot.slane %v121_v17, %v2446_v6  ;;  %v330_v22 = vrot.slane %v121_v17, %v2448_v7 }
  0x79   :  { %v1326_v4 = vcombine.high %v1324_v12, %v1324_v12  ;;  %v1672_v23 = vsel %vm2880_vm3, %v1325_v13, %v802_v60  ;;  %v1673_v24 = vsel %vm2888_vm4, %v1324_v12, %v806_v0  ;;  %v334_v25 = vrot.slane %v121_v17, %v2450_v8 }
  0x7a   :  { %v2005_v26 = vcombine.low %v1997_v3, %v2004_v18  ;;  %v2006_v27 = vcombine.low %v1671_v63, %v1672_v23  ;;  %vm2921_vm7 = vcmp.eq.s32.totalorder %v322_v19, 1  ;;  %vm2929_vm8 = vcmp.eq.s32.totalorder %v326_v21, 1  ;;  %v2990_v18 = vld [vmem:[#allocation5 + $0x38] sm:$0xff] }
  0x7b   :  { %v1674_v31 = vsel %vm2892_vm5, %v1326_v4, %v810_v11  ;;  %vm2933_vm9 = vcmp.eq.s32.totalorder %v330_v22, 1  ;;  %vm2937_vm10 = vcmp.eq.s32.totalorder %v334_v25, 1  ;;  %v818_v37 = vrot.slane %v2909_v61, %v2446_v6 }
  0x7c   :  { %2261 = vst [vmem:[#allocation8 + $0x50] sm:$0xff] %v2005_v26  ;;  %v2007_v35 = vcombine.low %v1673_v24, %v1674_v31  ;;  %v2014_v36 = vrot.slane %v2006_v27, %v2452_v9  ;;  %v822_v38 = vrot.slane %v2909_v61, %v2448_v7  ;;  %v1327_v39 = vcombine.high %v103_v28, %v103_v28 }
  0x7d   :  { %v1334_v40 = vrot.slane %v103_v28, %v2452_v9  ;;  %v338_v41 = vrot.slane %v121_v17, %v2454_v10  ;;  %v342_v42 = vrot.slane %v121_v17, %v2458_v14  ;;  %v826_v44 = vrot.slane %v2909_v61, %v2450_v8  ;;  %v105_v28 = vld [vmem:[#allocation2 + $0x70] sm:$0xff] }
  0x7e   :  { %v2021_v43 = vrot.slane %v2007_v35, %v2452_v9  ;;  %v346_v45 = vrot.slane %v121_v17, %v2460_v15  ;;  %v350_v47 = vrot.slane %v121_v17, %v2462_v16  ;;  %v1341_v48 = vrot.slane %v1327_v39, %v2452_v9 }
  0x7f   :  { %v1342_v49 = vcombine.high %v1334_v40, %v1334_v40  ;;  %v1675_v50 = vsel %vm2921_vm7, %v1334_v40, %v814_v30  ;;  %v830_v52 = vrot.slane %v2909_v61, %v2454_v10  ;;  %vm2959_vm11 = vcmp.eq.s32.totalorder %v338_v41, 1 }
  0x80   :  { %v2022_v53 = vcombine.low %v2014_v36, %v2021_v43  ;;  %vm2963_vm12 = vcmp.eq.s32.totalorder %v342_v42, 1  ;;  %vm2967_vm13 = vcmp.eq.s32.totalorder %v346_v45, 1  ;;  %v1343_v58 = vcombine.high %v1341_v48, %v1341_v48 }
  0x81   :  { %v1676_v59 = vsel %vm2929_vm8, %v1342_v49, %v818_v37  ;;  %v1677_v60 = vsel %vm2933_vm9, %v1341_v48, %v822_v38  ;;  %vm2975_vm14 = vcmp.eq.s32.totalorder %v350_v47, 1  ;;  %v834_v1 = vrot.slane %v2909_v61, %v2458_v14 }
  0x82   :  { %2262 = vst [vmem:[#allocation8 + $0x58] sm:$0xff] %v2022_v53  ;;  %v2023_v0 = vcombine.low %v1675_v50, %v1676_v59  ;;  %v838_v2 = vrot.slane %v2909_v61, %v2460_v15  ;;  %v1344_v46 = vcombine.high %v104_v51, %v104_v51  ;;  %v1678_v3 = vsel %vm2937_vm10, %v1343_v58, %v826_v44 }
  0x83   :  { %v842_v11 = vrot.slane %v2909_v61, %v2462_v16  ;;  %v1351_v12 = vrot.slane %v104_v51, %v2452_v9  ;;  %vm86_vm15 = vcmp.ne.f32.partialorder %v61_v57, 0.0  ;;  %v2024_v13 = vcombine.low %v1677_v60, %v1678_v3  ;;  %v112_v60 = vld [vmem:[#allocation2 + $0xa8] sm:$0xff] }
  0x84   :  { %v2031_v63 = vrot.slane %v2023_v0, %v2452_v9  ;;  %v1358_v17 = vrot.slane %v1344_v46, %v2452_v9  ;;  %v122_v19 = vsel %vm86_vm15, 1, %v2413_v20  ;;  %v846_v31 = vrot.slane %v2990_v18, %v2444_v5 }
  0x85   :  { %v1359_v21 = vcombine.high %v1351_v12, %v1351_v12  ;;  %v1679_v22 = vsel %vm2959_vm11, %v1351_v12, %v830_v52  ;;  %v354_v4 = vrot.slane %v122_v19, %v2444_v5  ;;  %v358_v61 = vrot.slane %v122_v19, %v2446_v6 }
  0x86   :  { %v2038_v23 = vrot.slane %v2024_v13, %v2452_v9  ;;  %v1360_v24 = vcombine.high %v1358_v17, %v1358_v17  ;;  %v1681_v25 = vsel %vm2967_vm13, %v1358_v17, %v838_v2  ;;  %v362_v26 = vrot.slane %v122_v19, %v2448_v7 }
  0x87   :  { %v1680_v27 = vsel %vm2963_vm12, %v1359_v21, %v834_v1  ;;  %v366_v29 = vrot.slane %v122_v19, %v2450_v8  ;;  %vm3004_vm0 = vcmp.eq.s32.totalorder %v354_v4, 1  ;;  %vm3012_vm1 = vcmp.eq.s32.totalorder %v358_v61, 1  ;;  %v3069_v61 = vld [vmem:[#allocation5 + $0x40] sm:$0xff] }
  0x88   :  { %v2039_v32 = vcombine.low %v2031_v63, %v2038_v23  ;;  %v1682_v33 = vsel %vm2975_vm14, %v1360_v24, %v842_v11  ;;  %v2040_v34 = vcombine.low %v1679_v22, %v1680_v27  ;;  %vm3016_vm2 = vcmp.eq.s32.totalorder %v362_v26, 1 }
  0x89   :  { %v2041_v36 = vcombine.low %v1681_v25, %v1682_v33  ;;  %v850_v38 = vrot.slane %v2990_v18, %v2446_v6  ;;  %v854_v39 = vrot.slane %v2990_v18, %v2448_v7  ;;  %v858_v41 = vrot.slane %v2990_v18, %v2450_v8  ;;  %v107_v33 = vld [vmem:[#allocation2 + $0x80] sm:$0xff] }
  0x8a   :  { %2263 = vst [vmem:[#allocation8 + $0x60] sm:$0xff] %v2039_v32  ;;  %v2048_v40 = vrot.slane %v2040_v34, %v2452_v9  ;;  %v1361_v42 = vcombine.high %v105_v28, %v105_v28  ;;  %v1368_v43 = vrot.slane %v105_v28, %v2452_v9  ;;  %v370_v45 = vrot.slane %v122_v19, %v2454_v10 }
  0x8b   :  { %v2055_v44 = vrot.slane %v2041_v36, %v2452_v9  ;;  %v374_v47 = vrot.slane %v122_v19, %v2458_v14  ;;  %v378_v48 = vrot.slane %v122_v19, %v2460_v15  ;;  %v382_v52 = vrot.slane %v122_v19, %v2462_v16 }
  0x8c   :  { %v1375_v49 = vrot.slane %v1361_v42, %v2452_v9  ;;  %v1376_v50 = vcombine.high %v1368_v43, %v1368_v43  ;;  %v1683_v51 = vsel %vm3004_vm0, %v1368_v43, %v846_v31  ;;  %vm570_vm3 = vcmp.eq.s32.totalorder %v366_v29, 1 }
  0x8d   :  { %v2056_v53 = vcombine.low %v2048_v40, %v2055_v44  ;;  %vm3036_vm4 = vcmp.eq.s32.totalorder %v370_v45, 1  ;;  %vm3040_vm5 = vcmp.eq.s32.totalorder %v374_v47, 1  ;;  %vm3048_vm6 = vcmp.eq.s32.totalorder %v378_v48, 1 }
  0x8e   :  { %v1377_v57 = vcombine.high %v1375_v49, %v1375_v49  ;;  %v1684_v58 = vsel %vm3012_vm1, %v1376_v50, %v850_v38  ;;  %v1685_v59 = vsel %vm3016_vm2, %v1375_v49, %v854_v39  ;;  %vm3052_vm7 = vcmp.eq.s32.totalorder %v382_v52, 1 }
  0x8f   :  { %2264 = vst [vmem:[#allocation8 + $0x68] sm:$0xff] %v2056_v53  ;;  %v2057_v0 = vcombine.low %v1683_v51, %v1684_v58  ;;  %v862_v2 = vrot.slane %v2990_v18, %v2454_v10  ;;  %v866_v46 = vrot.slane %v2990_v18, %v2458_v14  ;;  %v870_v11 = vrot.slane %v2990_v18, %v2460_v15 }
  0x90   :  { %v1686_v3 = vsel %vm570_vm3, %v1377_v57, %v858_v41  ;;  %v1378_v12 = vcombine.high %v106_v54, %v106_v54  ;;  %v1385_v13 = vrot.slane %v106_v54, %v2452_v9  ;;  %v874_v19 = vrot.slane %v2990_v18, %v2462_v16 }
  0x91   :  { %v2058_v63 = vcombine.low %v1685_v59, %v1686_v3  ;;  %v2065_v17 = vrot.slane %v2057_v0, %v2452_v9  ;;  %vm87_vm8 = vcmp.ne.f32.partialorder %v62_v62, 0.0  ;;  %v878_v35 = vrot.slane %v3069_v61, %v2444_v5  ;;  %v63_v0 = vld [vmem:[#allocation7 + $0x48] sm:$0xff]  ;;  %v110_v59 = vld [vmem:[#allocation2 + $0x98] sm:$0xff]  ;;  %v64_v3 = vld [vmem:[#allocation7 + $0x50] sm:$0xff] }
  0x92   :  { %v1392_v21 = vrot.slane %v1378_v12, %v2452_v9  ;;  %v1393_v22 = vcombine.high %v1385_v13, %v1385_v13  ;;  %v1687_v4 = vsel %vm3036_vm4, %v1385_v13, %v862_v2  ;;  %v123_v23 = vsel %vm87_vm8, 1, %v2413_v20 }
  0x93   :  { %v2072_v24 = vrot.slane %v2058_v63, %v2452_v9  ;;  %v386_v25 = vrot.slane %v123_v23, %v2444_v5  ;;  %v390_v26 = vrot.slane %v123_v23, %v2446_v6  ;;  %v394_v27 = vrot.slane %v123_v23, %v2448_v7 }
  0x94   :  { %v1394_v18 = vcombine.high %v1392_v21, %v1392_v21  ;;  %v1688_v28 = vsel %vm3040_vm5, %v1393_v22, %v866_v46  ;;  %v1689_v29 = vsel %vm3048_vm6, %v1392_v21, %v870_v11  ;;  %v398_v30 = vrot.slane %v123_v23, %v2450_v8 }
  0x95   :  { %v2073_v31 = vcombine.low %v2065_v17, %v2072_v24  ;;  %v2074_v32 = vcombine.low %v1687_v4, %v1688_v28  ;;  %vm3081_vm9 = vcmp.eq.s32.totalorder %v386_v25, 1  ;;  %vm3089_vm10 = vcmp.eq.s32.totalorder %v390_v26, 1  ;;  %v3150_v24 = vld [vmem:[#allocation5 + $0x48] sm:$0xff] }
  0x96   :  { %v1690_v36 = vsel %vm3052_vm7, %v1394_v18, %v874_v19  ;;  %vm3093_vm11 = vcmp.eq.s32.totalorder %v394_v27, 1  ;;  %vm3097_vm12 = vcmp.eq.s32.totalorder %v398_v30, 1  ;;  %v882_v42 = vrot.slane %v3069_v61, %v2446_v6 }
  0x97   :  { %2265 = vst [vmem:[#allocation8 + $0x70] sm:$0xff] %v2073_v31  ;;  %v2075_v40 = vcombine.low %v1689_v29, %v1690_v36  ;;  %v2082_v41 = vrot.slane %v2074_v32, %v2452_v9  ;;  %v886_v43 = vrot.slane %v3069_v61, %v2448_v7  ;;  %v1395_v44 = vcombine.high %v107_v33, %v107_v33 }
  0x98   :  { %v1402_v45 = vrot.slane %v107_v33, %v2452_v9  ;;  %v402_v47 = vrot.slane %v123_v23, %v2454_v10  ;;  %v406_v48 = vrot.slane %v123_v23, %v2458_v14  ;;  %v890_v50 = vrot.slane %v3069_v61, %v2450_v8  ;;  %v109_v33 = vld [vmem:[#allocation2 + $0x90] sm:$0xff] }
  0x99   :  { %v2089_v49 = vrot.slane %v2075_v40, %v2452_v9  ;;  %v410_v51 = vrot.slane %v123_v23, %v2460_v15  ;;  %v414_v52 = vrot.slane %v123_v23, %v2462_v16  ;;  %v1409_v53 = vrot.slane %v1395_v44, %v2452_v9 }
  0x9a   :  { %v1410_v54 = vcombine.high %v1402_v45, %v1402_v45  ;;  %v1691_v55 = vsel %vm3081_vm9, %v1402_v45, %v878_v35  ;;  %v894_v57 = vrot.slane %v3069_v61, %v2454_v10  ;;  %vm3119_vm13 = vcmp.eq.s32.totalorder %v402_v47, 1 }
  0x9b   :  { %v2090_v58 = vcombine.low %v2082_v41, %v2089_v49  ;;  %vm3123_vm14 = vcmp.eq.s32.totalorder %v406_v48, 1  ;;  %vm3127_vm15 = vcmp.eq.s32.totalorder %v410_v51, 1  ;;  %v1411_v1 = vcombine.high %v1409_v53, %v1409_v53 }
  0x9c   :  { %v1692_v2 = vsel %vm3089_vm10, %v1410_v54, %v882_v42  ;;  %v1693_v46 = vsel %vm3093_vm11, %v1409_v53, %v886_v43  ;;  %vm3135_vm0 = vcmp.eq.s32.totalorder %v414_v52, 1  ;;  %v898_v12 = vrot.slane %v3069_v61, %v2458_v14 }
  0x9d   :  { %2266 = vst [vmem:[#allocation8 + $0x78] sm:$0xff] %v2090_v58  ;;  %v2091_v11 = vcombine.low %v1691_v55, %v1692_v2  ;;  %v902_v13 = vrot.slane %v3069_v61, %v2460_v15  ;;  %v1412_v63 = vcombine.high %v108_v56, %v108_v56  ;;  %v1694_v17 = vsel %vm3097_vm12, %v1411_v1, %v890_v50 }
  0x9e   :  { %v906_v19 = vrot.slane %v3069_v61, %v2462_v16  ;;  %v1419_v21 = vrot.slane %v108_v56, %v2452_v9  ;;  %vm88_vm1 = vcmp.ne.f32.partialorder %v63_v0, 0.0  ;;  %v2092_v22 = vcombine.low %v1693_v46, %v1694_v17 }
  0x9f   :  { %v2099_v4 = vrot.slane %v2091_v11, %v2452_v9  ;;  %v1426_v23 = vrot.slane %v1412_v63, %v2452_v9  ;;  %v124_v25 = vsel %vm88_vm1, 1, %v2413_v20  ;;  %v910_v36 = vrot.slane %v3150_v24, %v2444_v5 }
  0xa0   :  { %v1427_v26 = vcombine.high %v1419_v21, %v1419_v21  ;;  %v1695_v27 = vsel %vm3119_vm13, %v1419_v21, %v894_v57  ;;  %v418_v18 = vrot.slane %v124_v25, %v2444_v5  ;;  %v422_v61 = vrot.slane %v124_v25, %v2446_v6 }
  0xa1   :  { %v2106_v28 = vrot.slane %v2092_v22, %v2452_v9  ;;  %v1428_v29 = vcombine.high %v1426_v23, %v1426_v23  ;;  %v1697_v30 = vsel %vm3127_vm15, %v1426_v23, %v902_v13  ;;  %v426_v31 = vrot.slane %v124_v25, %v2448_v7 }
  0xa2   :  { %v1696_v32 = vsel %vm3123_vm14, %v1427_v26, %v898_v12  ;;  %v430_v34 = vrot.slane %v124_v25, %v2450_v8  ;;  %vm3164_vm2 = vcmp.eq.s32.totalorder %v418_v18, 1  ;;  %vm3172_vm3 = vcmp.eq.s32.totalorder %v422_v61, 1  ;;  %v3229_v61 = vld [vmem:[#allocation5 + $0x50] sm:$0xff] }
  0xa3   :  { %v2107_v37 = vcombine.low %v2099_v4, %v2106_v28  ;;  %v1698_v38 = vsel %vm3135_vm0, %v1428_v29, %v906_v19  ;;  %v2108_v39 = vcombine.low %v1695_v27, %v1696_v32  ;;  %vm3176_vm4 = vcmp.eq.s32.totalorder %v426_v31, 1 }
  0xa4   :  { %v2109_v41 = vcombine.low %v1697_v30, %v1698_v38  ;;  %v914_v43 = vrot.slane %v3150_v24, %v2446_v6  ;;  %v918_v44 = vrot.slane %v3150_v24, %v2448_v7  ;;  %v922_v47 = vrot.slane %v3150_v24, %v2450_v8 }
  0xa5   :  { %2267 = vst [vmem:[#allocation8 + $0x80] sm:$0xff] %v2107_v37  ;;  %v2116_v45 = vrot.slane %v2108_v39, %v2452_v9  ;;  %v1429_v48 = vcombine.high %v109_v33, %v109_v33  ;;  %v1436_v49 = vrot.slane %v109_v33, %v2452_v9  ;;  %v434_v51 = vrot.slane %v124_v25, %v2454_v10  ;;  %v111_v37 = vld [vmem:[#allocation2 + $0xa0] sm:$0xff] }
  0xa6   :  { %v2123_v50 = vrot.slane %v2109_v41, %v2452_v9  ;;  %v438_v52 = vrot.slane %v124_v25, %v2458_v14  ;;  %v442_v53 = vrot.slane %v124_v25, %v2460_v15  ;;  %v446_v57 = vrot.slane %v124_v25, %v2462_v16 }
  0xa7   :  { %v1443_v54 = vrot.slane %v1429_v48, %v2452_v9  ;;  %v1444_v55 = vcombine.high %v1436_v49, %v1436_v49  ;;  %v1699_v56 = vsel %vm3164_vm2, %v1436_v49, %v910_v36  ;;  %vm586_vm5 = vcmp.eq.s32.totalorder %v430_v34, 1 }
  0xa8   :  { %v2124_v58 = vcombine.low %v2116_v45, %v2123_v50  ;;  %vm3196_vm6 = vcmp.eq.s32.totalorder %v434_v51, 1  ;;  %vm3200_vm7 = vcmp.eq.s32.totalorder %v438_v52, 1  ;;  %vm3208_vm8 = vcmp.eq.s32.totalorder %v442_v53, 1 }
  0xa9   :  { %v1445_v0 = vcombine.high %v1443_v54, %v1443_v54  ;;  %v1700_v1 = vsel %vm3172_vm3, %v1444_v55, %v914_v43  ;;  %v1701_v2 = vsel %vm3176_vm4, %v1443_v54, %v918_v44  ;;  %vm3212_vm9 = vcmp.eq.s32.totalorder %v446_v57, 1  ;;  %v114_v54 = vld [vmem:[#allocation2 + $0xb8] sm:$0xff] }
  0xaa   :  { %2268 = vst [vmem:[#allocation8 + $0x88] sm:$0xff] %v2124_v58  ;;  %v2125_v11 = vcombine.low %v1699_v56, %v1700_v1  ;;  %v926_v13 = vrot.slane %v3150_v24, %v2454_v10  ;;  %v930_v63 = vrot.slane %v3150_v24, %v2458_v14  ;;  %v934_v19 = vrot.slane %v3150_v24, %v2460_v15 }
  0xab   :  { %v1702_v17 = vsel %vm586_vm5, %v1445_v0, %v922_v47  ;;  %v1446_v21 = vcombine.high %v110_v59, %v110_v59  ;;  %v1453_v22 = vrot.slane %v110_v59, %v2452_v9  ;;  %v938_v25 = vrot.slane %v3150_v24, %v2462_v16 }
  0xac   :  { %v2126_v4 = vcombine.low %v1701_v2, %v1702_v17  ;;  %v2133_v23 = vrot.slane %v2125_v11, %v2452_v9  ;;  %vm89_vm10 = vcmp.ne.f32.partialorder %v64_v3, 0.0  ;;  %v942_v39 = vrot.slane %v3229_v61, %v2444_v5  ;;  %v65_v3 = vld [vmem:[#allocation7 + $0x58] sm:$0xff] }
  0xad   :  { %v1460_v26 = vrot.slane %v1446_v21, %v2452_v9  ;;  %v1461_v27 = vcombine.high %v1453_v22, %v1453_v22  ;;  %v1703_v18 = vsel %vm3196_vm6, %v1453_v22, %v926_v13  ;;  %v125_v28 = vsel %vm89_vm10, 1, %v2413_v20 }
  0xae   :  { %v2140_v29 = vrot.slane %v2126_v4, %v2452_v9  ;;  %v450_v30 = vrot.slane %v125_v28, %v2444_v5  ;;  %v454_v31 = vrot.slane %v125_v28, %v2446_v6  ;;  %v458_v32 = vrot.slane %v125_v28, %v2448_v7 }
  0xaf   :  { %v1462_v24 = vcombine.high %v1460_v26, %v1460_v26  ;;  %v1704_v33 = vsel %vm3200_vm7, %v1461_v27, %v930_v63  ;;  %v1705_v34 = vsel %vm3208_vm8, %v1460_v26, %v934_v19  ;;  %v462_v38 = vrot.slane %v125_v28, %v2450_v8 }
  0xb0   :  { %v2141_v35 = vcombine.low %v2133_v23, %v2140_v29  ;;  %v2142_v36 = vcombine.low %v1703_v18, %v1704_v33  ;;  %vm3245_vm11 = vcmp.eq.s32.totalorder %v450_v30, 1  ;;  %vm3249_vm12 = vcmp.eq.s32.totalorder %v454_v31, 1  ;;  %v3309_v31 = vld [vmem:[#allocation5 + $0x58] sm:$0xff] }
  0xb1   :  { %v1706_v40 = vsel %vm3212_vm9, %v1462_v24, %v938_v25  ;;  %vm3253_vm13 = vcmp.eq.s32.totalorder %v458_v32, 1  ;;  %v946_v47 = vrot.slane %v3229_v61, %v2446_v6  ;;  %v950_v48 = vrot.slane %v3229_v61, %v2448_v7 }
  0xb2   :  { %2269 = vst [vmem:[#allocation8 + $0x90] sm:$0xff] %v2141_v35  ;;  %v2143_v44 = vcombine.low %v1705_v34, %v1706_v40  ;;  %v2150_v45 = vrot.slane %v2142_v36, %v2452_v9  ;;  %v1463_v49 = vcombine.high %v111_v37, %v111_v37  ;;  %v1470_v50 = vrot.slane %v111_v37, %v2452_v9  ;;  %v113_v35 = vld [vmem:[#allocation2 + $0xb0] sm:$0xff] }
  0xb3   :  { %v466_v51 = vrot.slane %v125_v28, %v2454_v10  ;;  %v470_v52 = vrot.slane %v125_v28, %v2458_v14  ;;  %vm3266_vm14 = vcmp.eq.s32.totalorder %v462_v38, 1  ;;  %v954_v55 = vrot.slane %v3229_v61, %v2450_v8 }
  0xb4   :  { %v2157_v53 = vrot.slane %v2143_v44, %v2452_v9  ;;  %v474_v56 = vrot.slane %v125_v28, %v2460_v15  ;;  %v1477_v57 = vrot.slane %v1463_v49, %v2452_v9  ;;  %v1478_v58 = vcombine.high %v1470_v50, %v1470_v50 }
  0xb5   :  { %v1707_v59 = vsel %vm3245_vm11, %v1470_v50, %v942_v39  ;;  %v478_v62 = vrot.slane %v125_v28, %v2462_v16  ;;  %vm3277_vm15 = vcmp.eq.s32.totalorder %v466_v51, 1  ;;  %vm3281_vm0 = vcmp.eq.s32.totalorder %v470_v52, 1 }
  0xb6   :  { %v2158_v0 = vcombine.low %v2150_v45, %v2157_v53  ;;  %v958_v46 = vrot.slane %v3229_v61, %v2454_v10  ;;  %v1479_v11 = vcombine.high %v1477_v57, %v1477_v57  ;;  %v1708_v12 = vsel %vm3249_vm12, %v1478_v58, %v946_v47 }
  0xb7   :  { %v1709_v13 = vsel %vm3253_vm13, %v1477_v57, %v950_v48  ;;  %vm3291_vm1 = vcmp.eq.s32.totalorder %v474_v56, 1  ;;  %v2159_v17 = vcombine.low %v1707_v59, %v1708_v12  ;;  %v962_v19 = vrot.slane %v3229_v61, %v2458_v14 }
  0xb8   :  { %2270 = vst [vmem:[#allocation8 + $0x98] sm:$0xff] %v2158_v0  ;;  %v966_v21 = vrot.slane %v3229_v61, %v2460_v15  ;;  %v1480_v22 = vcombine.high %v112_v60, %v112_v60  ;;  %v1710_v4 = vsel %vm3266_vm14, %v1479_v11, %v954_v55  ;;  %v970_v23 = vrot.slane %v3229_v61, %v2462_v16 }
  0xb9   :  { %v1487_v25 = vrot.slane %v112_v60, %v2452_v9  ;;  %vm90_vm2 = vcmp.ne.f32.partialorder %v65_v3, 0.0  ;;  %v2160_v26 = vcombine.low %v1709_v13, %v1710_v4  ;;  %v2167_v27 = vrot.slane %v2159_v17, %v2452_v9 }
  0xba   :  { %v1494_v18 = vrot.slane %v1480_v22, %v2452_v9  ;;  %v126_v28 = vsel %vm90_vm2, 1, %v2413_v20  ;;  %vm598_vm3 = vcmp.eq.s32.totalorder %v478_v62, 1  ;;  %v974_v40 = vrot.slane %v3309_v31, %v2444_v5 }
  0xbb   :  { %v1495_v29 = vcombine.high %v1487_v25, %v1487_v25  ;;  %v1711_v30 = vsel %vm3277_vm15, %v1487_v25, %v958_v46  ;;  %v482_v32 = vrot.slane %v126_v28, %v2444_v5  ;;  %v2174_v61 = vrot.slane %v2160_v26, %v2452_v9 }
  0xbc   :  { %v1496_v24 = vcombine.high %v1494_v18, %v1494_v18  ;;  %v1713_v33 = vsel %vm3291_vm1, %v1494_v18, %v966_v21  ;;  %v486_v20 = vrot.slane %v126_v28, %v2446_v6  ;;  %v490_v36 = vrot.slane %v126_v28, %v2448_v7 }
  0xbd   :  { %v1712_v34 = vsel %vm3281_vm0, %v1495_v29, %v962_v19  ;;  %v2175_v37 = vcombine.low %v2167_v27, %v2174_v61  ;;  %v494_v42 = vrot.slane %v126_v28, %v2450_v8  ;;  %vm599_vm4 = vcmp.eq.s32.totalorder %v482_v32, 1 }
  0xbe   :  { %v1714_v38 = vsel %vm598_vm3, %v1496_v24, %v970_v23  ;;  %v2176_v39 = vcombine.low %v1711_v30, %v1712_v34  ;;  %v978_v43 = vrot.slane %v3309_v31, %v2446_v6  ;;  %v982_v45 = vrot.slane %v3309_v31, %v2448_v7 }
  0xbf   :  { %v2177_v41 = vcombine.low %v1713_v33, %v1714_v38  ;;  %2271 = vst [vmem:[#allocation8 + $0xa0] sm:$0xff] %v2175_v37  ;;  %v1497_v47 = vcombine.high %v113_v35, %v113_v35  ;;  %v1504_v48 = vrot.slane %v113_v35, %v2452_v9  ;;  %vm600_vm5 = vcmp.eq.s32.totalorder %v486_v20, 1 }
  0xc0   :  { %v2184_v44 = vrot.slane %v2176_v39, %v2452_v9  ;;  %vm601_vm6 = vcmp.eq.s32.totalorder %v490_v36, 1  ;;  %v498_v5 = vrot.slane %v126_v28, %v2454_v10  ;;  %v986_v50 = vrot.slane %v3309_v31, %v2450_v8 }
  0xc1   :  { %v2191_v49 = vrot.slane %v2177_v41, %v2452_v9  ;;  %v1511_v6 = vrot.slane %v1497_v47, %v2452_v9  ;;  %v1512_v51 = vcombine.high %v1504_v48, %v1504_v48  ;;  %v1715_v52 = vsel %vm599_vm4, %v1504_v48, %v974_v40 }
  0xc2   :  { %vm602_vm7 = vcmp.eq.s32.totalorder %v494_v42, 1  ;;  %v502_v7 = vrot.slane %v126_v28, %v2458_v14  ;;  %v506_v55 = vrot.slane %v126_v28, %v2460_v15  ;;  %v510_v59 = vrot.slane %v126_v28, %v2462_v16 }
  0xc3   :  { %v2192_v53 = vcombine.low %v2184_v44, %v2191_v49  ;;  %v1513_v56 = vcombine.high %v1511_v6, %v1511_v6  ;;  %v1716_v57 = vsel %vm600_vm5, %v1512_v51, %v978_v43  ;;  %v1717_v58 = vsel %vm601_vm6, %v1511_v6, %v982_v45 }
  0xc4   :  { %v2193_v60 = vcombine.low %v1715_v52, %v1716_v57  ;;  %vm603_vm8 = vcmp.eq.s32.totalorder %v498_v5, 1  ;;  %v990_v8 = vrot.slane %v3309_v31, %v2454_v10  ;;  %v994_v62 = vrot.slane %v3309_v31, %v2458_v14 }
  0xc5   :  { %2272 = vst [vmem:[#allocation8 + $0xa8] sm:$0xff] %v2192_v53  ;;  %v1718_v0 = vsel %vm602_vm7, %v1513_v56, %v986_v50  ;;  %v998_v1 = vrot.slane %v3309_v31, %v2460_v15  ;;  %v1514_v2 = vcombine.high %v114_v54, %v114_v54  ;;  %v1521_v46 = vrot.slane %v114_v54, %v2452_v9 }
  0xc6   :  { %v2194_v3 = vcombine.low %v1717_v58, %v1718_v0  ;;  %v2201_v11 = vrot.slane %v2193_v60, %v2452_v9  ;;  %vm604_vm9 = vcmp.eq.s32.totalorder %v502_v7, 1  ;;  %vm605_vm10 = vcmp.eq.s32.totalorder %v506_v55, 1 }
  0xc7   :  { %v1002_v12 = vrot.slane %v3309_v31, %v2462_v16  ;;  %v1528_v10 = vrot.slane %v1514_v2, %v2452_v9  ;;  %v1529_v13 = vcombine.high %v1521_v46, %v1521_v46  ;;  %v1719_v63 = vsel %vm603_vm8, %v1521_v46, %v990_v8 }
  0xc8   :  { %v2208_v14 = vrot.slane %v2194_v3, %v2452_v9  ;;  %vm606_vm11 = vcmp.eq.s32.totalorder %v510_v59, 1 }
  0xc9   :  { %v1530_v17 = vcombine.high %v1528_v10, %v1528_v10  ;;  %v1720_v15 = vsel %vm604_vm9, %v1529_v13, %v994_v62  ;;  %v1721_v19 = vsel %vm605_vm10, %v1528_v10, %v998_v1 }
  0xca   :  { %v2209_v21 = vcombine.low %v2201_v11, %v2208_v14  ;;  %v2210_v22 = vcombine.low %v1719_v63, %v1720_v15 }
  0xcb   :  { %v1722_v4 = vsel %vm606_vm11, %v1530_v17, %v1002_v12 }
  0xcc   :  { %2273 = vst [vmem:[#allocation8 + $0xb0] sm:$0xff] %v2209_v21  ;;  %v2211_v23 = vcombine.low %v1721_v19, %v1722_v4  ;;  %v2218_v25 = vrot.slane %v2210_v22, %v2452_v9 }
  0xce   :  { %v2225_v16 = vrot.slane %v2211_v23, %v2452_v9 }
  0xd0   :  { %v2226_v26 = vcombine.low %v2218_v25, %v2225_v16 }
  0xd2   :  { %2274 = vst [vmem:[#allocation8 + $0xb8] sm:$0xff] %v2226_v26 }
  0xd3   :  { %2394 = shalt.err (!%p2391_p5)
}
  0xd4   :  { %2284 = dma.vmem_to_hbm [thread:$0]  %s2282_s2, 3072, %s3356_s3, [#allocation4]  }
  0xd5   :  { %2407 = dma.done.wait [#allocation4], 3072  }
  0xd6   :  { %2408 = vsyncadd [#allocation4], 4294964224 }
  0xd7   :  { %2288 = vsyncpa [#allocation3], 1 }
  0xd8   :  { %2289 = vsyncpa [#allocation6], 1 }
  0xd9   :  { %2290 = vsyncpa [#allocation4], 1 }

</bundles_post_ra>
